<compile_context>
chip_gen: v7x
topology: tpu7x:2x2x1
jax: 0.10.0
libtpu: 0.0.40
codegen_flags: <defaults>
</compile_context>

<pallas_src>
import jax
import jax.numpy as jnp
import numpy as np
from jax.experimental import pallas as pl
from jax.experimental.pallas import tpu as pltpu

LEAK = 0.2
BN_EPS = 1e-5
K = 4


def _leaky(x):
    return jnp.where(x > 0, x, LEAK * x)


def make_encoder_kernel(B, isize, nc, ndf, nz):
    """Fused encoder kernel for the isize==16 topology (one pyramid layer)."""
    C1 = ndf
    C2 = 2 * ndf
    L1 = isize // 2
    L2 = L1 // 2
    assert L2 == K, "final conv (k=4, p=0) expects spatial size 4"
    half = (L1 // 2) * B                # rows per spatial-parity group of h1

    def kernel(p1_ref, w1_ref, w2_ref, w3_ref, gamma_ref, beta_ref, out_ref):
        # ---- layer 1: Conv(nc -> ndf, k=4, s=2, p=1) + LeakyReLU, ONE matmul.
        # The im2col patch matrix is built in the wrapper (pure layout).  Rows are
        # ordered (parity r of the output position t, t//2, b) so the two spatial
        # parity groups below are contiguous sublane slabs; cols are (k, cin).
        h1 = _leaky(jnp.dot(p1_ref[...], w1_ref[...],
                            preferred_element_type=jnp.float32))          # (L1*B, C1)
        h1_even = h1[:half, :]          # spatial positions 0,2,4,6  (rows: (t//2, b))
        h1_odd = h1[half:, :]           # spatial positions 1,3,5,7

        # ---- layer 2: Conv(ndf -> 2ndf, k=4, s=2, p=1), pre-activation, ONE matmul.
        # With p=1, padded position ip holds h1[ip-1]; tap k of output t' reads
        # ip = 2*t' + k.  Even/odd padded-position sequences are one concat each,
        # and every tap is a CONTIGUOUS slab of one of them (no strided slicing).
        zero_b = jnp.zeros((B, C1), jnp.float32)
        even_seq = jnp.concatenate([zero_b, h1_odd], axis=0)    # padded pos 0,2,4,6,8
        odd_seq = jnp.concatenate([h1_even, zero_b], axis=0)    # padded pos 1,3,5,7,9
        nrow = L2 * B
        patch2 = jnp.concatenate(
            [even_seq[:nrow, :],                 # tap k=0 -> padded pos {0,2,4,6}
             odd_seq[:nrow, :],                  # tap k=1 -> {1,3,5,7}
             even_seq[B:B + nrow, :],            # tap k=2 -> {2,4,6,8}
             odd_seq[B:B + nrow, :]],            # tap k=3 -> {3,5,7,9}
            axis=-1)                                                     # (L2*B, K*C1)
        z2 = jnp.dot(patch2, w2_ref[...],
                     preferred_element_type=jnp.float32)                 # (L2*B, C2)

        # ---- BatchNorm (training mode: stats over all (t', b) rows), folded into a
        # single per-channel scale/shift, then LeakyReLU.  Kept in f32.
        mean = jnp.mean(z2, axis=0, keepdims=True)                       # (1, C2)
        var = jnp.mean((z2 - mean) ** 2, axis=0, keepdims=True)          # biased var
        scale = gamma_ref[...] * jax.lax.rsqrt(var + BN_EPS)             # (1, C2)
        shift = beta_ref[...] - mean * scale                             # (1, C2)
        h2 = _leaky(z2 * scale + shift)                                  # (L2*B, C2)

        # ---- final conv: Conv(2ndf -> nz, k=4, s=1, p=0) -> length 1, ONE matmul.
        # Structured relayout: 4 contiguous (B, C2) slabs lane-concatenated
        # (replaces the previous 8 single-row gathers + nested concats).
        patch3 = jnp.concatenate(
            [h2[t * B:(t + 1) * B, :] for t in range(K)], axis=-1)       # (B, K*C2)
        out = jnp.dot(patch3, w3_ref[...],
                      preferred_element_type=jnp.float32)                # (B, nz)
        out_ref[...] = out.astype(out_ref.dtype)

    return kernel


def prepare_params(w1, w2, w3, gamma, beta):
    """One-time (per weight update) re-layout: Conv weights (Cout, Cin, K) ->
    im2col matrices (K*Cin, Cout); BN affine params -> (1, C2)."""
    C1, nc, k1 = w1.shape
    C2, _, k2 = w2.shape
    nz, _, k3 = w3.shape
    assert k1 == k2 == k3 == K
    w1f = jnp.transpose(w1, (2, 1, 0)).reshape(K * nc, C1).astype(jnp.float32)
    w2f = jnp.transpose(w2, (2, 1, 0)).reshape(K * C1, C2).astype(jnp.float32)
    w3f = jnp.transpose(w3, (2, 1, 0)).reshape(K * C2, nz).astype(jnp.float32)
    g = gamma.reshape(1, C2).astype(jnp.float32)
    b = beta.reshape(1, C2).astype(jnp.float32)
    return (w1f, w2f, w3f, g, b)


def _im2col_layer1(x_ncl):
    """Wrapper-side im2col for the first conv (pure layout; fuses into the XLA
    glue).  Rows ordered (parity(t), t//2, b); cols ordered (k, cin), cin fastest,
    matching the (K*nc, C1) flattened weight."""
    B, nc, isize = x_ncl.shape
    L1 = isize // 2
    xp = jnp.pad(x_ncl.astype(jnp.float32), ((0, 0), (0, 0), (1, 1)))   # (B, nc, isize+2)
    # tap k of output position t reads padded index 2*t + k
    win = jnp.stack(
        [xp[:, :, k:k + 2 * L1 - 1:2] for k in range(K)], axis=-1)      # (B, nc, L1, K)
    win = win.reshape(B, nc, L1 // 2, 2, K)                             # t = 2*j + r
    patch1 = jnp.transpose(win, (3, 2, 0, 4, 1))                        # (r, j, B, K, nc)
    return patch1.reshape(L1 * B, K * nc)


@jax.jit
def encoder_1d_forward(x_ncl, params):
    """x_ncl: (B, nc, isize) like the PyTorch module.  Returns (B, nz, 1)."""
    w1f, w2f, w3f, gamma2d, beta2d = params
    B, nc, isize = x_ncl.shape
    C1 = w1f.shape[1]
    nz = w3f.shape[1]

    patch1 = _im2col_layer1(x_ncl)                                      # (L1*B, K*nc)

    kernel = make_encoder_kernel(B, isize, nc, C1, nz)
    vmem_spec = pl.BlockSpec(memory_space=pltpu.MemorySpace.VMEM)

    out = pl.pallas_call(
        kernel,
        out_shape=jax.ShapeDtypeStruct((B, nz), jnp.float32),
        in_specs=[vmem_spec] * 6,
        out_specs=vmem_spec,
    )(patch1, w1f, w2f, w3f, gamma2d, beta2d)

    return out[:, :, None]                                              # (B, nz, 1)


# ----------------------------- pure-JAX reference -----------------------------
def encoder_1d_reference(x, w1, w2, w3, gamma, beta):
    dn = ('NCH', 'OIH', 'NCH')
    h = jax.lax.conv_general_dilated(x, w1, (2,), [(1, 1)], dimension_numbers=dn)
    h = jnp.where(h > 0, h, LEAK * h)
    h = jax.lax.conv_general_dilated(h, w2, (2,), [(1, 1)], dimension_numbers=dn)
    mean = jnp.mean(h, axis=(0, 2), keepdims=True)
    var = jnp.mean((h - mean) ** 2, axis=(0, 2), keepdims=True)
    h = (h - mean) / jnp.sqrt(var + BN_EPS)
    h = h * gamma[None, :, None] + beta[None, :, None]
    h = jnp.where(h > 0, h, LEAK * h)
    h = jax.lax.conv_general_dilated(h, w3, (1,), [(0, 0)], dimension_numbers=dn)
    return h


if __name__ == "__main__":
    # Small shapes consistent with NetD: nc=2, isize (window_size) multiple of 16.
    B, nc, isize, ndf, nz = 2, 2, 16, 8, 16
    C1, C2 = ndf, 2 * ndf

    key = jax.random.PRNGKey(0)
    kx, k1, k2, k3, kg, kb = jax.random.split(key, 6)

    x = jax.random.normal(kx, (B, nc, isize), dtype=jnp.float32)
    w1 = 0.05 * jax.random.normal(k1, (C1, nc, 4), dtype=jnp.float32)
    w2 = 0.05 * jax.random.normal(k2, (C2, C1, 4), dtype=jnp.float32)
    w3 = 0.05 * jax.random.normal(k3, (nz, C2, 4), dtype=jnp.float32)
    gamma = 1.0 + 0.1 * jax.random.normal(kg, (C2,), dtype=jnp.float32)
    beta = 0.1 * jax.random.normal(kb, (C2,), dtype=jnp.float32)

    # Weight re-layout hoisted out of the per-call path (done once per update).
    params = prepare_params(w1, w2, w3, gamma, beta)

    out = jax.block_until_ready(encoder_1d_forward(x, params))

    ref = jax.block_until_ready(encoder_1d_reference(x, w1, w2, w3, gamma, beta))
    assert out.shape == (B, nz, 1), out.shape
    np.testing.assert_allclose(np.asarray(out), np.asarray(ref), rtol=1e-2, atol=1e-2)

    print("KERNEL_OK")
</pallas_src>

<mosaic_0001>
module attributes {stable_mosaic.version = 11 : i64} {
  func.func @kernel(%arg0: memref<16x8xf32, #tpu.memory_space<vmem>>, %arg1: memref<8x8xf32, #tpu.memory_space<vmem>>, %arg2: memref<32x16xf32, #tpu.memory_space<vmem>>, %arg3: memref<64x16xf32, #tpu.memory_space<vmem>>, %arg4: memref<1x16xf32, #tpu.memory_space<vmem>>, %arg5: memref<1x16xf32, #tpu.memory_space<vmem>>, %arg6: memref<2x16xf32, #tpu.memory_space<vmem>>) attributes {dimension_semantics = [], scalar_prefetch = 0 : i64, scratch_operands = 0 : i64, tpu.core_type = #tpu.core_type<tc>} {
    %c0 = arith.constant 0 : index
    %c0_0 = arith.constant 0 : index
    %0 = vector.load %arg0[%c0, %c0_0] : memref<16x8xf32, #tpu.memory_space<vmem>>, vector<16x8xf32>
    %c0_1 = arith.constant 0 : index
    %c0_2 = arith.constant 0 : index
    %1 = vector.load %arg1[%c0_1, %c0_2] : memref<8x8xf32, #tpu.memory_space<vmem>>, vector<8x8xf32>
    %cst = arith.constant dense<0.000000e+00> : vector<16x8xf32>
    %2 = tpu.matmul %0, %1, %cst {dimension_numbers = #tpu.dot_dimension_numbers<[1], [0], [0], [1], [0, 0, 1, 1], [], []>} : vector<16x8xf32>, vector<8x8xf32>, vector<16x8xf32> -> vector<16x8xf32>
    %cst_3 = arith.constant 0.000000e+00 : f32
    %3 = vector.broadcast %cst_3 : f32 to vector<16x8xf32>
    %4 = arith.cmpf ogt, %2, %3 : vector<16x8xf32>
    %cst_4 = arith.constant 2.000000e-01 : f32
    %5 = vector.broadcast %cst_4 : f32 to vector<16x8xf32>
    %6 = arith.mulf %5, %2 : vector<16x8xf32>
    %7 = arith.select %4, %2, %6 : vector<16x8xi1>, vector<16x8xf32>
    %8 = vector.extract_strided_slice %7 {offsets = [0, 0], sizes = [8, 8], strides = [1, 1]} : vector<16x8xf32> to vector<8x8xf32>
    %9 = vector.extract_strided_slice %7 {offsets = [8, 0], sizes = [8, 8], strides = [1, 1]} : vector<16x8xf32> to vector<8x8xf32>
    %cst_5 = arith.constant 0.000000e+00 : f32
    %10 = vector.broadcast %cst_5 : f32 to vector<2x8xf32>
    %11 = tpu.concatenate %10, %9 in 0 : vector<2x8xf32>, vector<8x8xf32> -> vector<10x8xf32>
    %12 = tpu.concatenate %8, %10 in 0 : vector<8x8xf32>, vector<2x8xf32> -> vector<10x8xf32>
    %13 = vector.extract_strided_slice %11 {offsets = [0, 0], sizes = [8, 8], strides = [1, 1]} : vector<10x8xf32> to vector<8x8xf32>
    %14 = vector.extract_strided_slice %12 {offsets = [0, 0], sizes = [8, 8], strides = [1, 1]} : vector<10x8xf32> to vector<8x8xf32>
    %15 = vector.extract_strided_slice %11 {offsets = [2, 0], sizes = [8, 8], strides = [1, 1]} : vector<10x8xf32> to vector<8x8xf32>
    %16 = vector.extract_strided_slice %12 {offsets = [2, 0], sizes = [8, 8], strides = [1, 1]} : vector<10x8xf32> to vector<8x8xf32>
    %17 = tpu.concatenate %13, %14, %15, %16 in 1 : vector<8x8xf32>, vector<8x8xf32>, vector<8x8xf32>, vector<8x8xf32> -> vector<8x32xf32>
    %c0_6 = arith.constant 0 : index
    %c0_7 = arith.constant 0 : index
    %18 = vector.load %arg2[%c0_6, %c0_7] : memref<32x16xf32, #tpu.memory_space<vmem>>, vector<32x16xf32>
    %cst_8 = arith.constant dense<0.000000e+00> : vector<8x16xf32>
    %19 = tpu.matmul %17, %18, %cst_8 {dimension_numbers = #tpu.dot_dimension_numbers<[1], [0], [0], [1], [0, 0, 1, 1], [], []>} : vector<8x32xf32>, vector<32x16xf32>, vector<8x16xf32> -> vector<8x16xf32>
    %cst_9 = arith.constant dense<0.000000e+00> : vector<16xf32>
    %20 = vector.multi_reduction <add>, %19, %cst_9 [0] : vector<8x16xf32> to vector<16xf32>
    %21 = vector.shape_cast %20 : vector<16xf32> to vector<1x16xf32>
    %cst_10 = arith.constant 8.000000e+00 : f32
    %22 = vector.broadcast %cst_10 : f32 to vector<1x16xf32>
    %23 = arith.divf %21, %22 : vector<1x16xf32>
    %24 = vector.broadcast %23 : vector<1x16xf32> to vector<8x16xf32>
    %25 = arith.subf %19, %24 : vector<8x16xf32>
    %26 = arith.mulf %25, %25 : vector<8x16xf32>
    %cst_11 = arith.constant dense<0.000000e+00> : vector<16xf32>
    %27 = vector.multi_reduction <add>, %26, %cst_11 [0] : vector<8x16xf32> to vector<16xf32>
    %28 = vector.shape_cast %27 : vector<16xf32> to vector<1x16xf32>
    %cst_12 = arith.constant 8.000000e+00 : f32
    %29 = vector.broadcast %cst_12 : f32 to vector<1x16xf32>
    %30 = arith.divf %28, %29 : vector<1x16xf32>
    %c0_13 = arith.constant 0 : index
    %c0_14 = arith.constant 0 : index
    %31 = vector.load %arg4[%c0_13, %c0_14] : memref<1x16xf32, #tpu.memory_space<vmem>>, vector<1x16xf32>
    %cst_15 = arith.constant 9.99999974E-6 : f32
    %32 = vector.broadcast %cst_15 : f32 to vector<1x16xf32>
    %33 = arith.addf %30, %32 : vector<1x16xf32>
    %34 = math.rsqrt %33 : vector<1x16xf32>
    %35 = arith.mulf %31, %34 : vector<1x16xf32>
    %c0_16 = arith.constant 0 : index
    %c0_17 = arith.constant 0 : index
    %36 = vector.load %arg5[%c0_16, %c0_17] : memref<1x16xf32, #tpu.memory_space<vmem>>, vector<1x16xf32>
    %37 = arith.mulf %23, %35 : vector<1x16xf32>
    %38 = arith.subf %36, %37 : vector<1x16xf32>
    %39 = vector.broadcast %35 : vector<1x16xf32> to vector<8x16xf32>
    %40 = arith.mulf %19, %39 : vector<8x16xf32>
    %41 = vector.broadcast %38 : vector<1x16xf32> to vector<8x16xf32>
    %42 = arith.addf %40, %41 : vector<8x16xf32>
    %cst_18 = arith.constant 0.000000e+00 : f32
    %43 = vector.broadcast %cst_18 : f32 to vector<8x16xf32>
    %44 = arith.cmpf ogt, %42, %43 : vector<8x16xf32>
    %cst_19 = arith.constant 2.000000e-01 : f32
    %45 = vector.broadcast %cst_19 : f32 to vector<8x16xf32>
    %46 = arith.mulf %45, %42 : vector<8x16xf32>
    %47 = arith.select %44, %42, %46 : vector<8x16xi1>, vector<8x16xf32>
    %48 = vector.extract_strided_slice %47 {offsets = [0, 0], sizes = [2, 16], strides = [1, 1]} : vector<8x16xf32> to vector<2x16xf32>
    %49 = vector.extract_strided_slice %47 {offsets = [2, 0], sizes = [2, 16], strides = [1, 1]} : vector<8x16xf32> to vector<2x16xf32>
    %50 = vector.extract_strided_slice %47 {offsets = [4, 0], sizes = [2, 16], strides = [1, 1]} : vector<8x16xf32> to vector<2x16xf32>
    %51 = vector.extract_strided_slice %47 {offsets = [6, 0], sizes = [2, 16], strides = [1, 1]} : vector<8x16xf32> to vector<2x16xf32>
    %52 = tpu.concatenate %48, %49, %50, %51 in 1 : vector<2x16xf32>, vector<2x16xf32>, vector<2x16xf32>, vector<2x16xf32> -> vector<2x64xf32>
    %c0_20 = arith.constant 0 : index
    %c0_21 = arith.constant 0 : index
    %53 = vector.load %arg3[%c0_20, %c0_21] : memref<64x16xf32, #tpu.memory_space<vmem>>, vector<64x16xf32>
    %cst_22 = arith.constant dense<0.000000e+00> : vector<2x16xf32>
    %54 = tpu.matmul %52, %53, %cst_22 {dimension_numbers = #tpu.dot_dimension_numbers<[1], [0], [0], [1], [0, 0, 1, 1], [], []>} : vector<2x64xf32>, vector<64x16xf32>, vector<2x16xf32> -> vector<2x16xf32>
    %c0_23 = arith.constant 0 : index
    %c0_24 = arith.constant 0 : index
    %55 = vector.load %arg6[%c0_23, %c0_24] : memref<2x16xf32, #tpu.memory_space<vmem>>, vector<2x16xf32>
    tpu.vector_store %arg6[%c0_23, %c0_24], %54 {strides = array<i32>} : memref<2x16xf32, #tpu.memory_space<vmem>>, vector<2x16xf32>,
    return
  }
}

</mosaic_0001>

<bundles_post_ra>
// kernel: encoder_1d_forward.1
= control target key start
LH: loop header
LB: loop body
LE: loop exit
PB: predicated region body
PF: predicated region fallthrough
CT: control target
= control target key end

     0   :  { %vm27_vm0 = vcmask 64512   ;;  %s613_s0 = inlined_call_operand.vmem [shape: f32[16,8], index: 0, kind: input, shape index: {}]   ;;  %s614_s1 = inlined_call_operand.vmem [shape: f32[8,8], index: 1, kind: input, shape index: {}]   ;;  %s615_s2 = inlined_call_operand.vmem [shape: f32[32,16], index: 2, kind: input, shape index: {}]   ;;  %s616_s3 = inlined_call_operand.vmem [shape: f32[64,16], index: 3, kind: input, shape index: {}]   ;;  %s617_s4 = inlined_call_operand.vmem [shape: f32[1,16], index: 4, kind: input, shape index: {}]   ;;  %s618_s5 = inlined_call_operand.vmem [shape: f32[1,16], index: 5, kind: input, shape index: {}]   ;;  %s619_s6 = inlined_call_operand.hbm [shape: f32[2,16], index: 6, kind: output, shape index: {}]  }
   0x1   :  { %v26_v0 = vld [vmem:[%s614_s1] sm:$0xff]  ;;  %v25_v2 = vld [vmem:[%s613_s0 + $0x8] sm:$0xff] }
   0x2   :  { %v24_v1 = vld [vmem:[%s613_s0] sm:$0xff]  ;;  %401 = vmatprep.subr.mxu1 %v26_v0 }
   0x3   :  { %403 = vmatprep.mubr.msk.f32.mxu1 %vm27_vm0, %v24_v1 }
   0x4   :  { %11 = vsyncpa [#allocation3], 0  ;;  %402 = vmatpush3.msra.mxu1 %v26_v0  ;;  %v489_v3 = vmov 0.0|0.0   ;;  %v144_v4 = vld [vmem:[%s615_s2] sm:$0xff]  ;;  %v145_v5 = vld [vmem:[%s615_s2 + $0x8] sm:$0xff]  ;;  %vm490_vm1 = vmmov 0   ;;  %v249_v61 = vlaneseq }
   0x5   :  { %404 = vmatmul.mubr.msk.f32.vlgmr.msra.gmra.mrb[0].mxu1 %vm27_vm0, %v25_v2  ;;  %436 = vmatprep.subr.bf16.mxu1 %v489_v3  ;;  %v437_v6 = vpack.c.bf16 %v145_v5, %v144_v4  ;;  %v146_v7 = vld [vmem:[%s615_s2 + $0x10] sm:$0xff]  ;;  %v147_v8 = vld [vmem:[%s615_s2 + $0x18] sm:$0xff]  ;;  %v491_v10 = vmov 0.0   ;;  %vm118_vm4 = vcmask 1041408   ;;  %vm125_vm5 = vcmask 1045504   ;;  %s492_s9 = smov 8  }
   0x6   :  { %442 = vmatprep.subr.bf16.mxu0 %v489_v3  ;;  %v440_v9 = vpack.c.bf16 %v147_v8, %v146_v7  ;;  %414 = vmatprep.mubr.msk.f32.mxu1 %vm490_vm1, %v491_v10  ;;  %v134_v16 = vrot.slane %v491_v10, 2  ;;  %s493_s2 = smov 24   ;;  %s494_s10 = smov 16   ;;  %vm140_vm6 = vcmask 130048   ;;  %vm142_vm7 = vcmask 195584   ;;  %v282_v31 = vld [vmem:[%s616_s3] sm:$0xff] }
   0x7   :  { %438 = vmatpush3.bf16.msra.mxu1 %v437_v6  ;;  %433 = vmatprep.mubr.msk.f32.mxu0 %vm490_vm1, %v491_v10  ;;  %vm148_vm8 = vcmask 261120   ;;  %v283_v32 = vld [vmem:[%s616_s3 + $0x8] sm:$0xff]  ;;  %v284_v33 = vld [vmem:[%s616_s3 + $0x10] sm:$0xff]  ;;  %v285_v35 = vld [vmem:[%s616_s3 + $0x18] sm:$0xff]  ;;  %v250_v62 = vshrl.u32 %v249_v61, 7  ;;  %vm280_vm10 = vcmask 392192  }
   0x8   :  { %439 = vmatprep.subr.bf16.mxu1 %v489_v3  ;;  %v443_v34 = vpack.c.bf16 %v283_v32, %v282_v31  ;;  %v446_v36 = vpack.c.bf16 %v285_v35, %v284_v33  ;;  %v286_v37 = vld [vmem:[%s616_s3 + $0x20] sm:$0xff]  ;;  %v287_v38 = vld [vmem:[%s616_s3 + $0x28] sm:$0xff]  ;;  %v288_v4 = vld [vmem:[%s616_s3 + $0x30] sm:$0xff]  ;;  %vm290_vm11 = vcmask 523264   ;;  %vm364_vm12 = vcmask 123904  }
   0x9   :  { %v449_v39 = vpack.c.bf16 %v287_v38, %v286_v37  ;;  %v241_v63 = vld [vmem:[%s617_s4] sm:$0x1]  ;;  %v251_v0 = vsub.s32 0, %v250_v62  ;;  %v289_v5 = vld [vmem:[%s616_s3 + $0x38] sm:$0xff]  ;;  %s495_s4 = smov 32   ;;  %s497_s3 = smov [#allocation2]  }
   0xa   :  { %444 = vmatpush3.bf16.msra.mxu0 %v443_v34  ;;  %v452_v8 = vpack.c.bf16 %v289_v5, %v288_v4  ;;  %s372_s0 = sshll.u32 %s497_s3, 4  ;;  %s373_s0 = int_to_ptr.vmem [resolvable:$true] %s372_s0 }
   0xb   :  { %441 = vmatpush3.bf16.msra.mxu1 %v440_v9  ;;  %445 = vmatprep.subr.bf16.mxu0 %v489_v3  ;;  %s465_s30 = scalar_lea.vmem %s373_s0, 32  ;;  %p470_p1 = scmp.lt.s32.totalorder %s373_s0, %s373_s0 }
   0xc   :  { %p466_p0 = scmp.ne.s32.totalorder %s373_s0, %s465_s30  ;;  %p471_p2 = scmp.lt.s32.totalorder %s465_s30, %s465_s30 }
   0xe   :  { %447 = vmatpush3.bf16.msra.mxu0 %v446_v36  ;;  %p472_p3 = por %p471_p2, %p470_p1 }
   0xf   :  { %448 = vmatprep.subr.bf16.mxu0 %v489_v3 }
  0x10   :  { %p473_p4 = pnand %p472_p3, %p466_p0 }
  0x12   :  { %450 = vmatpush3.bf16.msra.mxu0 %v449_v39 }
  0x13   :  { %451 = vmatprep.subr.bf16.mxu0 %v489_v3  ;;  %v245_v3 = vld [vmem:[%s618_s5] sm:$0x1]  ;;  %s496_s5 = smov 48  }
  0x16   :  { %453 = vmatpush3.bf16.msra.mxu0 %v452_v8 }
  0xd8   :  { %v405_v11 = vpop.f32.mrb[0].mxu1 }
  0xd9   :  { %vm110_vm2 = vcmp.gt.f32.partialorder %v405_v11, 0.0  ;;  %v112_v12 = vmul.f32 0.2, %v405_v11  ;;  %v100_v13 = vpop.f32.mrb[1].mxu1 }
  0xda   :  { %v111_v14 = vmul.f32 0.2, %v100_v13  ;;  %vm109_vm3 = vcmp.gt.f32.partialorder %v100_v13, 0.0 }
  0xdb   :  { %v114_v15 = vsel %vm110_vm2, %v405_v11, %v112_v12 }
  0xdc   :  { %v116_v17 = vrot.slane %v114_v15, 6  ;;  %v113_v18 = vsel %vm109_vm3, %v100_v13, %v111_v14 }
  0xdd   :  { %121 = vrot.lane.b32.xlu0 %v113_v18, %s492_s9  ;;  %v133_v19 = vrot.slane %v113_v18, 2 }
  0xde   :  { %v119_v20 = vsel %vm118_vm4, 0.0, %v116_v17  ;;  %v127_v21 = vrot.slane %v116_v17, 2 }
  0xdf   :  { %v135_v22 = vsel %vm125_vm5, %v133_v19, %v134_v16  ;;  %v126_v23 = vrot.slane %v119_v20, 2 }
  0xe0   :  { %136 = vrot.lane.b32.xlu1 %v135_v22, %s493_s2 }
  0xe1   :  { %v128_v24 = vsel %vm125_vm5, %v126_v23, %v127_v21 }
  0xe2   :  { %129 = vrot.lane.b32.xlu0 %v128_v24, %s494_s10 }
 0x14f   :  { %v122_v25 = vpop.permute.xlu0 %121 }
 0x150   :  { %v139_v26 = vsel %vm27_vm0, %v119_v20, %v122_v25 }
 0x152   :  { %v137_v28 = vpop.permute.xlu1 %136 }
 0x154   :  { %v130_v27 = vpop.permute.xlu0 %129 }
 0x155   :  { %v141_v29 = vsel %vm140_vm6, %v139_v26, %v130_v27 }
 0x156   :  { %v143_v30 = vsel %vm142_vm7, %v141_v29, %v137_v28 }
 0x157   :  { %415 = vmatmul.mubr.msk.f32.vlgmr.msra.gmra.mrb[2].mxu1 %vm148_vm8, %v143_v30 }
 0x22a   :  { %v218_v40 = vpop.f32.mrb[2].mxu1 }
 0x22b   :  { %v222_v41 = vsel %vm140_vm6, %v218_v40, 0.0  ;;  %v416_v42 = vpop.f32.mrb[3].mxu1 }
 0x22c   :  { %v223_v43 = vrot.slane %v222_v41, 4 }
 0x22e   :  { %v224_v44 = vadd.f32 %v223_v43, %v222_v41 }
 0x230   :  { %v225_v45 = vrot.slane %v224_v44, 2 }
 0x232   :  { %v226_v46 = vadd.f32 %v225_v45, %v224_v44 }
 0x234   :  { %v227_v47 = vrot.slane %v226_v46, 1 }
 0x236   :  { %v228_v48 = vadd.f32 %v227_v47, %v226_v46 }
 0x238   :  { %v230_v49 = vmul.f32 0.125, %v228_v48 }
 0x23a   :  { %v231_v50 = vsub.f32 %v218_v40, %v230_v49 }
 0x23c   :  { %v232_v51 = vmul.f32 %v231_v50, %v231_v50 }
 0x23e   :  { %v233_v52 = vsel %vm140_vm6, %v232_v51, 0.0 }
 0x23f   :  { %v234_v53 = vrot.slane %v233_v52, 4 }
 0x241   :  { %v235_v54 = vadd.f32 %v234_v53, %v233_v52 }
 0x243   :  { %v236_v55 = vrot.slane %v235_v54, 2 }
 0x245   :  { %v237_v56 = vadd.f32 %v236_v55, %v235_v54 }
 0x247   :  { %v238_v57 = vrot.slane %v237_v56, 1 }
 0x249   :  { %v239_v58 = vadd.f32 %v238_v57, %v237_v56 }
 0x24b   :  { %v240_v59 = vmul.f32 0.125, %v239_v58 }
 0x24d   :  { %v242_v60 = vadd.f32 1e-05, %v240_v59 }
 0x24f   :  { %463 = vrsqrt.f32 %v242_v60 }
 0x259   :  { %v464_v1 = vpop.eup %463 }
 0x25a   :  { %v244_v2 = vmul.f32 %v464_v1, %v241_v63 }
 0x25c   :  { %v246_v6 = vmul.f32 %v244_v2, %v230_v49  ;;  %v252_v7 = vrot.slane %v244_v2, %v251_v0 }
 0x25e   :  { %v247_v9 = vsub.f32 %v245_v3, %v246_v6  ;;  %v254_v10 = vmul.f32 %v252_v7, %v218_v40 }
 0x260   :  { %v259_v11 = vrot.slane %v247_v9, %v251_v0 }
 0x262   :  { %v261_v12 = vadd.f32 %v259_v11, %v254_v10 }
 0x264   :  { %vm262_vm9 = vcmp.gt.f32.partialorder %v261_v12, 0.0  ;;  %v263_v13 = vmul.f32 0.2, %v261_v12 }
 0x266   :  { %v264_v14 = vsel %vm262_vm9, %v261_v12, %v263_v13 }
 0x267   :  { %v270_v15 = vrot.slane %v264_v14, 4  ;;  %v266_v16 = vrot.slane %v264_v14, 2  ;;  %v274_v17 = vrot.slane %v264_v14, 6 }
 0x269   :  { %271 = vrot.lane.b32.xlu0 %v270_v15, %s495_s4  ;;  %267 = vrot.lane.b32.xlu1 %v266_v16, %s494_s10 }
 0x26d   :  { %275 = vrot.lane.b32.xlu1 %v274_v17, %s496_s5 }
 0x2db   :  { %v268_v18 = vpop.permute.xlu1 %267  ;;  %v272_v19 = vpop.permute.xlu0 %271 }
 0x2dc   :  { %v278_v20 = vsel %vm140_vm6, %v264_v14, %v268_v18 }
 0x2dd   :  { %v279_v21 = vsel %vm148_vm8, %v278_v20, %v272_v19 }
 0x2df   :  { %v276_v22 = vpop.permute.xlu1 %275 }
 0x2e0   :  { %v281_v23 = vsel %vm280_vm10, %v279_v21, %v276_v22 }
 0x2e1   :  { %434 = vmatmul.mubr.msk.f32.vlgmr.msra.gmra.mrb[0].mxu0 %vm290_vm11, %v281_v23 }
 0x3b4   :  { %v360_v24 = vpop.f32.mrb[0].mxu0 }
 0x3b5   :  { %365 = vst.msk [vmem:[#allocation2] sm:$0x3] %vm364_vm12, %v360_v24  ;;  %v435_v25 = vpop.f32.mrb[1].mxu0 }
 0x3b6   :  { %476 = shalt.err (!%p473_p4)
}
 0x3b7   :  { %s477_s9 = scalar_lea.hbm %s619_s6, 32 }
 0x3b8   :  { %p478_p5 = scmp.ne.s32.totalorder %s619_s6, %s477_s9  ;;  %p481_p6 = scmp.lt.u32.totalorder %s477_s9, %s619_s6 }
 0x3ba   :  { %p483_p7 = pnand %p481_p6, %p478_p5 }
 0x3bc   :  { %486 = shalt.err (!%p483_p7)
}
 0x3bd   :  { %375 = dma.vmem_to_hbm [thread:$0]  %s373_s0, 32, %s619_s6, [#allocation3]  }
 0x3be   :  { %487 = dma.done.wait [#allocation3], 32  }
 0x3bf   :  { %488 = vsyncadd [#allocation3], 4294967264 }
 0x3c0   :  { %379 = vsyncpa [#allocation3], 1 }

</bundles_post_ra>
